<compile_context>
chip_gen: v6e
topology: v6e:2x2x1
jax: 0.10.0
libtpu: 0.0.40
codegen_flags: <defaults>
</compile_context>

<pallas_src>
import numpy as np
import jax
import jax.numpy as jnp
from jax.experimental import pallas as pl
from jax.experimental.pallas import tpu as pltpu


# ---------------------------------------------------------------------------
# Kernel: fused inference MLP = 3x (matmul + bias) with activations.
# BN (running stats) + weight_norm folded into w*/b* on the host;
# Dropout is identity at inference.
# ---------------------------------------------------------------------------
def _fused_mlp_kernel(x_ref, w1_ref, b1_ref, w2_ref, b2_ref, w3_ref, b3_ref, o_ref):
    # layer 1 (BN1 + weight_norm folded) -> leaky_relu(0.001); x already bf16
    h = jnp.dot(x_ref[...], w1_ref[...],
                preferred_element_type=jnp.float32) + b1_ref[...]
    h = jnp.where(h > 0, h, 0.001 * h)

    # layer 2 (BN2 folded) -> relu
    h = jnp.dot(h.astype(jnp.bfloat16), w2_ref[...],
                preferred_element_type=jnp.float32) + b2_ref[...]
    h = jnp.maximum(h, 0.0)

    # layer 3 (BN3 folded), lane-padded output slab
    out = jnp.dot(h.astype(jnp.bfloat16), w3_ref[...],
                  preferred_element_type=jnp.float32) + b3_ref[...]
    o_ref[...] = out.astype(o_ref.dtype)


# ---------------------------------------------------------------------------
# Host-side parameter folding (exact at inference).
# ---------------------------------------------------------------------------
def _bn_affine(bn, eps=1e-5):
    scale = bn["gamma"] / jnp.sqrt(bn["var"] + eps)
    shift = bn["beta"] - bn["mean"] * scale
    return scale, shift


def _weight_norm_w(lin):
    # v: (out, in) torch-layout weight_v, g: (out,) weight_g (dim=0 default).
    v, g = lin["v"], lin["g"]
    norm = jnp.sqrt(jnp.sum(v * v, axis=1, keepdims=True))
    return (v * (g[:, None] / norm)).T                      # (in, out)


def _round_up(n, m):
    return ((n + m - 1) // m) * m


def fold_params(raw, num_targets):
    """Fold BN affine + weight_norm into effective bf16 weights / f32 biases.
    Pads the input-feature dim (W1 rows) and the output dim (W3 cols, bias)
    up to multiples of 128 with zeros (exact)."""
    def fold(bn, lin):
        s, t = _bn_affine(bn)
        w = _weight_norm_w(lin)                             # (in, out) f32
        w_eff = s[:, None] * w                              # BN scale into rows
        b_eff = t @ w + lin["b"]                            # BN shift into bias
        return w_eff, b_eff

    w1, b1 = fold(raw["bn1"], raw["lin1"])
    w2, b2 = fold(raw["bn2"], raw["lin2"])
    w3, b3 = fold(raw["bn3"], raw["lin3"])

    # Pad feature dim (x columns are padded to match in the wrapper).
    F = w1.shape[0]
    Fp = max(128, _round_up(F, 128))
    if Fp != F:
        w1 = jnp.pad(w1, ((0, Fp - F), (0, 0)))             # zero rows

    # Pad target dim to a lane-dense multiple of 128.
    T = num_targets
    Tp = max(128, _round_up(T, 128))
    if Tp != T:
        w3 = jnp.pad(w3, ((0, 0), (0, Tp - T)))             # zero columns
        b3 = jnp.pad(b3, ((0, Tp - T),))                    # zero bias in pad lanes

    bf16 = lambda w: w.astype(jnp.bfloat16)
    return dict(
        w1=bf16(w1), b1=b1[None, :],
        w2=bf16(w2), b2=b2[None, :],
        w3=bf16(w3), b3=b3[None, :],
        num_features=F,
    )


# ---------------------------------------------------------------------------
# Wrapper helpers.
# ---------------------------------------------------------------------------
def _is_multi_tensorcore():
    """True on chips with 2 TensorCores sharing a megacore (v4 / v5p / v7x)."""
    try:
        kind = jax.devices()[0].device_kind.lower()
    except Exception:
        return False
    return any(tag in kind for tag in ("v4", "v5p", "v7"))


def _pick_batch_block(B, multi_core):
    """Balanced batch block: minimizes pad rows; multi-step / even split only
    where a second TensorCore can use it."""
    if B <= 8:
        return B
    tb_cap = 512
    steps = -(-B // tb_cap)                 # minimal step count at the cap
    if multi_core:
        steps = max(steps, 2)               # give each TC work
        if B >= 1024:
            steps = max(steps, 4)            # each TC gets >= 2 pipelined steps
        if steps % 2:
            steps += 1                       # balance across the two TCs
    tb = -(-B // steps)
    tb = min(B, _round_up(tb, 8))
    return max(8, tb)


def _vmem_estimate(tb, Fp, H, Tp):
    """Tight VMEM footprint estimate (bytes)."""
    weights = (Fp * H + H * H + H * Tp) * 2 + (H + H + Tp) * 4   # single-buffered
    io = (tb * Fp * 2 + tb * Tp * 4) * 2                          # double-buffered x/out
    inter = tb * H * 4 * 4                                        # h intermediates headroom
    return weights + io + inter


def _buffered_weight_kwargs():
    """Single-buffer kwarg for grid-invariant weight blocks, with a narrow
    probe-based fallback if this jax version lacks pipeline_mode/Buffered."""
    try:
        mode = pl.Buffered(1)
        pl.BlockSpec((8, 128), lambda i: (0, 0), pipeline_mode=mode)
        return {"pipeline_mode": mode}
    except (AttributeError, TypeError):
        return {}


_VMEM_CAP_BYTES = 56 * 2**20   # safe headroom inside v7x's 64 MiB physical VMEM


def fused_mlp(x, folded, num_targets, *, batch_block=None):
    """x: (B, F) float32. folded: output of fold_params."""
    B, F = x.shape
    Fp, H = folded["w1"].shape
    Tp = folded["w3"].shape[1]
    assert F == folded["num_features"]

    multi_core = _is_multi_tensorcore()
    tb = _pick_batch_block(B, multi_core) if batch_block is None else batch_block

    # Shrink the batch block if the VMEM estimate would blow the cap
    # (e.g. very large hidden sizes) instead of silently over-requesting.
    while tb > 8 and int(_vmem_estimate(tb, Fp, H, Tp) * 1.3) > _VMEM_CAP_BYTES:
        tb = max(8, _round_up(tb // 2, 8))

    grid_b = -(-B // tb)
    Bp = grid_b * tb

    # Pad batch rows / feature columns with zeros and cast to bf16 on the host
    # (fuses with the pad in XLA; halves x DMA bytes + VMEM).
    x = jnp.pad(x, ((0, Bp - B), (0, Fp - F))).astype(jnp.bfloat16)

    vmem_limit = int(min(_VMEM_CAP_BYTES,
                         max(int(_vmem_estimate(tb, Fp, H, Tp) * 1.3), 16 * 2**20)))

    wkw = _buffered_weight_kwargs()

    def const_spec(r, c):
        # Grid-invariant block (weights/biases resident across the batch grid).
        return pl.BlockSpec((r, c), lambda i: (0, 0), **wkw)

    call = pl.pallas_call(
        _fused_mlp_kernel,
        out_shape=jax.ShapeDtypeStruct((Bp, Tp), jnp.float32),
        grid=(grid_b,),
        in_specs=[
            pl.BlockSpec((tb, Fp), lambda i: (i, 0)),        # x (bf16, lane-dense)
            const_spec(Fp, H), const_spec(1, H),             # W1, b1
            const_spec(H, H), const_spec(1, H),              # W2, b2
            const_spec(H, Tp), const_spec(1, Tp),            # W3, b3 (lane-padded)
        ],
        out_specs=pl.BlockSpec((tb, Tp), lambda i: (i, 0)),
        compiler_params=pltpu.CompilerParams(
            dimension_semantics=("parallel",),
            vmem_limit_bytes=vmem_limit,
        ),
    )

    out = call(x, folded["w1"], folded["b1"], folded["w2"], folded["b2"],
               folded["w3"], folded["b3"])
    return out[:B, :num_targets]


# ---------------------------------------------------------------------------
# Raw (torch-style) parameter construction + pure-JAX f32 reference.
# ---------------------------------------------------------------------------
def make_raw_params(key, num_features, hidden_size, num_targets):
    keys = iter(jax.random.split(key, 32))

    def linear(fan_in, fan_out):
        bound = 1.0 / np.sqrt(fan_in)
        v = jax.random.uniform(next(keys), (fan_out, fan_in), jnp.float32, -bound, bound)
        # torch weight_norm inits g = ||v|| per row; perturb for a nontrivial test.
        g = jnp.sqrt(jnp.sum(v * v, axis=1)) * (
            1.0 + 0.1 * jax.random.normal(next(keys), (fan_out,), jnp.float32))
        b = jax.random.uniform(next(keys), (fan_out,), jnp.float32, -bound, bound)
        return dict(v=v, g=g, b=b)

    def bn(dim):
        return dict(
            gamma=1.0 + 0.1 * jax.random.normal(next(keys), (dim,), jnp.float32),
            beta=0.1 * jax.random.normal(next(keys), (dim,), jnp.float32),
            mean=0.1 * jax.random.normal(next(keys), (dim,), jnp.float32),
            var=jax.random.uniform(next(keys), (dim,), jnp.float32, 0.5, 1.5),
        )

    return dict(bn1=bn(num_features), lin1=linear(num_features, hidden_size),
                bn2=bn(hidden_size), lin2=linear(hidden_size, hidden_size),
                bn3=bn(hidden_size), lin3=linear(hidden_size, num_targets))


def reference_model(x, raw):
    """Unfused f32 reference matching the PyTorch module in eval() mode."""
    def bn(h, p):
        s, t = _bn_affine(p)
        return h * s + t

    def lin(h, p):
        return h @ _weight_norm_w(p) + p["b"]

    h = bn(x, raw["bn1"])
    h = lin(h, raw["lin1"])
    h = jnp.where(h > 0, h, 0.001 * h)          # F.leaky_relu(.., 0.001)
    h = bn(h, raw["bn2"])
    h = jnp.maximum(lin(h, raw["lin2"]), 0.0)   # relu
    h = bn(h, raw["bn3"])
    return lin(h, raw["lin3"])


if __name__ == "__main__":
    # Small-scale analog of the MoA MLP (real model: ~875 -> 2048 -> 2048 -> 206).
    batch, num_features, hidden_size, num_targets = 16, 32, 128, 16

    key = jax.random.PRNGKey(0)
    kx, kp = jax.random.split(key)
    x = jax.random.normal(kx, (batch, num_features), jnp.float32)
    raw = make_raw_params(kp, num_features, hidden_size, num_targets)
    folded = fold_params(raw, num_targets)

    out = fused_mlp(x, folded, num_targets)
    out = jax.block_until_ready(out)

    ref = reference_model(x, raw)
    # bf16 weights/activations in the matmuls (f32 accumulation) -> relaxed tolerance.
    np.testing.assert_allclose(np.asarray(out), np.asarray(ref), rtol=3e-2, atol=3e-2)

    print("KERNEL_OK")
</pallas_src>

<mosaic_0001>
module attributes {stable_mosaic.version = 11 : i64} {
  func.func @_fused_mlp_kernel(%arg0: i32, %arg1: memref<16x128xbf16, #tpu.memory_space<vmem>>, %arg2: memref<128x128xbf16, #tpu.memory_space<vmem>>, %arg3: memref<1x128xf32, #tpu.memory_space<vmem>>, %arg4: memref<128x128xbf16, #tpu.memory_space<vmem>>, %arg5: memref<1x128xf32, #tpu.memory_space<vmem>>, %arg6: memref<128x128xbf16, #tpu.memory_space<vmem>>, %arg7: memref<1x128xf32, #tpu.memory_space<vmem>>, %arg8: memref<16x128xf32, #tpu.memory_space<vmem>>) attributes {dimension_semantics = [#tpu.dimension_semantics<parallel>], iteration_bounds = array<i64: 1>, scalar_prefetch = 0 : i64, scratch_operands = 0 : i64, tpu.core_type = #tpu.core_type<tc>, window_params = [{transform_indices = @transform_0, window_bounds = array<i64: 16, 128>}, {pipeline_mode = #tpu.pipeline_mode<synchronous>, transform_indices = @transform_1, window_bounds = array<i64: 128, 128>}, {pipeline_mode = #tpu.pipeline_mode<synchronous>, transform_indices = @transform_2, window_bounds = array<i64: 1, 128>}, {pipeline_mode = #tpu.pipeline_mode<synchronous>, transform_indices = @transform_3, window_bounds = array<i64: 128, 128>}, {pipeline_mode = #tpu.pipeline_mode<synchronous>, transform_indices = @transform_4, window_bounds = array<i64: 1, 128>}, {pipeline_mode = #tpu.pipeline_mode<synchronous>, transform_indices = @transform_5, window_bounds = array<i64: 128, 128>}, {pipeline_mode = #tpu.pipeline_mode<synchronous>, transform_indices = @transform_6, window_bounds = array<i64: 1, 128>}, {transform_indices = @transform_7, window_bounds = array<i64: 16, 128>}]} {
    %c0 = arith.constant 0 : index
    %c0_0 = arith.constant 0 : index
    %0 = vector.load %arg1[%c0, %c0_0] : memref<16x128xbf16, #tpu.memory_space<vmem>>, vector<16x128xbf16>
    %c0_1 = arith.constant 0 : index
    %c0_2 = arith.constant 0 : index
    %1 = vector.load %arg2[%c0_1, %c0_2] : memref<128x128xbf16, #tpu.memory_space<vmem>>, vector<128x128xbf16>
    %cst = arith.constant dense<0.000000e+00> : vector<16x128xf32>
    %2 = tpu.matmul %0, %1, %cst {dimension_numbers = #tpu.dot_dimension_numbers<[1], [0], [0], [1], [0, 0, 1, 1], [], []>} : vector<16x128xbf16>, vector<128x128xbf16>, vector<16x128xf32> -> vector<16x128xf32>
    %c0_3 = arith.constant 0 : index
    %c0_4 = arith.constant 0 : index
    %3 = vector.load %arg3[%c0_3, %c0_4] : memref<1x128xf32, #tpu.memory_space<vmem>>, vector<1x128xf32>
    %4 = vector.broadcast %3 : vector<1x128xf32> to vector<16x128xf32>
    %5 = arith.addf %2, %4 : vector<16x128xf32>
    %cst_5 = arith.constant 0.000000e+00 : f32
    %6 = vector.broadcast %cst_5 : f32 to vector<16x128xf32>
    %7 = arith.cmpf ogt, %5, %6 : vector<16x128xf32>
    %cst_6 = arith.constant 1.000000e-03 : f32
    %8 = vector.broadcast %cst_6 : f32 to vector<16x128xf32>
    %9 = arith.mulf %8, %5 : vector<16x128xf32>
    %10 = arith.select %7, %5, %9 : vector<16x128xi1>, vector<16x128xf32>
    %11 = arith.truncf %10 : vector<16x128xf32> to vector<16x128xbf16>
    %c0_7 = arith.constant 0 : index
    %c0_8 = arith.constant 0 : index
    %12 = vector.load %arg4[%c0_7, %c0_8] : memref<128x128xbf16, #tpu.memory_space<vmem>>, vector<128x128xbf16>
    %cst_9 = arith.constant dense<0.000000e+00> : vector<16x128xf32>
    %13 = tpu.matmul %11, %12, %cst_9 {dimension_numbers = #tpu.dot_dimension_numbers<[1], [0], [0], [1], [0, 0, 1, 1], [], []>} : vector<16x128xbf16>, vector<128x128xbf16>, vector<16x128xf32> -> vector<16x128xf32>
    %c0_10 = arith.constant 0 : index
    %c0_11 = arith.constant 0 : index
    %14 = vector.load %arg5[%c0_10, %c0_11] : memref<1x128xf32, #tpu.memory_space<vmem>>, vector<1x128xf32>
    %15 = vector.broadcast %14 : vector<1x128xf32> to vector<16x128xf32>
    %16 = arith.addf %13, %15 : vector<16x128xf32>
    %cst_12 = arith.constant 0.000000e+00 : f32
    %17 = vector.broadcast %cst_12 : f32 to vector<16x128xf32>
    %18 = arith.maximumf %16, %17 : vector<16x128xf32>
    %19 = arith.truncf %18 : vector<16x128xf32> to vector<16x128xbf16>
    %c0_13 = arith.constant 0 : index
    %c0_14 = arith.constant 0 : index
    %20 = vector.load %arg6[%c0_13, %c0_14] : memref<128x128xbf16, #tpu.memory_space<vmem>>, vector<128x128xbf16>
    %cst_15 = arith.constant dense<0.000000e+00> : vector<16x128xf32>
    %21 = tpu.matmul %19, %20, %cst_15 {dimension_numbers = #tpu.dot_dimension_numbers<[1], [0], [0], [1], [0, 0, 1, 1], [], []>} : vector<16x128xbf16>, vector<128x128xbf16>, vector<16x128xf32> -> vector<16x128xf32>
    %c0_16 = arith.constant 0 : index
    %c0_17 = arith.constant 0 : index
    %22 = vector.load %arg7[%c0_16, %c0_17] : memref<1x128xf32, #tpu.memory_space<vmem>>, vector<1x128xf32>
    %23 = vector.broadcast %22 : vector<1x128xf32> to vector<16x128xf32>
    %24 = arith.addf %21, %23 : vector<16x128xf32>
    %c0_18 = arith.constant 0 : index
    %c0_19 = arith.constant 0 : index
    %25 = vector.load %arg8[%c0_18, %c0_19] : memref<16x128xf32, #tpu.memory_space<vmem>>, vector<16x128xf32>
    tpu.vector_store %arg8[%c0_18, %c0_19], %24 {strides = array<i32>} : memref<16x128xf32, #tpu.memory_space<vmem>>, vector<16x128xf32>,
    return
  }
  func.func @transform_0(%arg0: i32) -> (i32, i32) {
    %c0_i32 = arith.constant 0 : i32
    %c0_i32_0 = arith.constant 0 : i32
    return %arg0, %c0_i32 : i32, i32
  }
  func.func @transform_1(%arg0: i32) -> (i32, i32) {
    %c0_i32 = arith.constant 0 : i32
    %c0_i32_0 = arith.constant 0 : i32
    %c0_i32_1 = arith.constant 0 : i32
    return %c0_i32, %c0_i32_0 : i32, i32
  }
  func.func @transform_2(%arg0: i32) -> (i32, i32) {
    %c0_i32 = arith.constant 0 : i32
    %c0_i32_0 = arith.constant 0 : i32
    %c0_i32_1 = arith.constant 0 : i32
    return %c0_i32, %c0_i32_0 : i32, i32
  }
  func.func @transform_3(%arg0: i32) -> (i32, i32) {
    %c0_i32 = arith.constant 0 : i32
    %c0_i32_0 = arith.constant 0 : i32
    %c0_i32_1 = arith.constant 0 : i32
    return %c0_i32, %c0_i32_0 : i32, i32
  }
  func.func @transform_4(%arg0: i32) -> (i32, i32) {
    %c0_i32 = arith.constant 0 : i32
    %c0_i32_0 = arith.constant 0 : i32
    %c0_i32_1 = arith.constant 0 : i32
    return %c0_i32, %c0_i32_0 : i32, i32
  }
  func.func @transform_5(%arg0: i32) -> (i32, i32) {
    %c0_i32 = arith.constant 0 : i32
    %c0_i32_0 = arith.constant 0 : i32
    %c0_i32_1 = arith.constant 0 : i32
    return %c0_i32, %c0_i32_0 : i32, i32
  }
  func.func @transform_6(%arg0: i32) -> (i32, i32) {
    %c0_i32 = arith.constant 0 : i32
    %c0_i32_0 = arith.constant 0 : i32
    %c0_i32_1 = arith.constant 0 : i32
    return %c0_i32, %c0_i32_0 : i32, i32
  }
  func.func @transform_7(%arg0: i32) -> (i32, i32) {
    %c0_i32 = arith.constant 0 : i32
    %c0_i32_0 = arith.constant 0 : i32
    return %arg0, %c0_i32 : i32, i32
  }
}

</mosaic_0001>

<bundles_post_ra>
// kernel: tpu_custom_call.1
= control target key start
LH: loop header
LB: loop body
LE: loop exit
PB: predicated region body
PF: predicated region fallthrough
CT: control target
= control target key end

     0   :  { %12 = vsyncpa [#allocation3], 0  ;;  %s834_s0 = inlined_call_operand.hbm [shape: bf16[16,128], index: 0, kind: input, shape index: {}]   ;;  %s835_s1 = inlined_call_operand.hbm [shape: bf16[128,128], index: 1, kind: input, shape index: {}]   ;;  %s836_s2 = inlined_call_operand.vmem [shape: f32[1,128], index: 2, kind: input, shape index: {}]   ;;  %s837_s3 = inlined_call_operand.hbm [shape: bf16[128,128], index: 3, kind: input, shape index: {}]   ;;  %s838_s4 = inlined_call_operand.vmem [shape: f32[1,128], index: 4, kind: input, shape index: {}]   ;;  %s839_s5 = inlined_call_operand.hbm [shape: bf16[128,128], index: 5, kind: input, shape index: {}]   ;;  %s840_s6 = inlined_call_operand.vmem [shape: f32[1,128], index: 6, kind: input, shape index: {}]   ;;  %s841_s7 = inlined_call_operand.hbm [shape: f32[16,128], index: 7, kind: output, shape index: {}]  }
   0x1   :  { %13 = vsyncpa [#allocation6], 0 }
   0x2   :  { %14 = vsyncpa [#allocation9], 0 }
   0x3   :  { %15 = vsyncpa [#allocation4], 0  ;;  %s717_s24 = smov [#allocation5]   ;;  %s718_s26 = smov [#allocation2]  }
   0x4   :  { %s33_s25 = sshll.u32 %s717_s24, 4  ;;  %s21_s27 = sshll.u32 %s718_s26, 4  ;;  %s34_s25 = int_to_ptr.vmem [resolvable:$true] %s33_s25  ;;  %s22_s27 = int_to_ptr.vmem [resolvable:$true] %s21_s27 }
   0x5   :  { %s617_s28 = scalar_lea.vmem %s34_s25, 1024  ;;  %p622_p1 = scmp.lt.s32.totalorder %s34_s25, %s34_s25 }
   0x6   :  { %p618_p0 = scmp.ne.s32.totalorder %s34_s25, %s617_s28  ;;  %p623_p2 = scmp.lt.s32.totalorder %s617_s28, %s617_s28 }
   0x8   :  { %p624_p3 = por %p623_p2, %p622_p1 }
   0xa   :  { %p625_p4 = pnand %p624_p3, %p618_p0 }
   0xc   :  { %628 = shalt.err (!%p625_p4)
}
   0xd   :  { %s719_s29 = smov 64   ;;  %s720_s30 = smov 4  }
   0xe   :  { %39 = dma.hbm_to_vmem [thread:$0]  %s835_s1, 1024, %s34_s25, [#allocation6], %s719_s29, %s719_s29, %s720_s30  }
   0xf   :  { %s637_s10 = scalar_lea.vmem %s22_s27, 128  ;;  %p642_p6 = scmp.lt.s32.totalorder %s22_s27, %s22_s27 }
  0x10   :  { %p638_p5 = scmp.ne.s32.totalorder %s22_s27, %s637_s10  ;;  %p643_p7 = scmp.lt.s32.totalorder %s637_s10, %s637_s10 }
  0x12   :  { %p644_p8 = por %p643_p7, %p642_p6 }
  0x14   :  { %p645_p9 = pnand %p644_p8, %p638_p5 }
  0x16   :  { %648 = shalt.err (!%p645_p9)
}
  0x17   :  { %27 = dma.hbm_to_vmem [thread:$0]  %s834_s0, 128, %s22_s27, [#allocation3], %s719_s29, %s719_s29, %s720_s30  }
  0x18   :  { %s721_s13 = smov [#allocation7]   ;;  %s722_s15 = smov [#allocation8]  }
  0x19   :  { %s47_s14 = sshll.u32 %s721_s13, 4  ;;  %s61_s16 = sshll.u32 %s722_s15, 4  ;;  %s48_s14 = int_to_ptr.vmem [resolvable:$true] %s47_s14  ;;  %s62_s16 = int_to_ptr.vmem [resolvable:$true] %s61_s16 }
  0x1a   :  { %s657_s1 = scalar_lea.vmem %s48_s14, 1024  ;;  %p662_p11 = scmp.lt.s32.totalorder %s48_s14, %s48_s14 }
  0x1b   :  { %p658_p10 = scmp.ne.s32.totalorder %s48_s14, %s657_s1  ;;  %p663_p12 = scmp.lt.s32.totalorder %s657_s1, %s657_s1 }
  0x1d   :  { %p664_p13 = por %p663_p12, %p662_p11 }
  0x1f   :  { %p665_p0 = pnand %p664_p13, %p658_p10 }
  0x21   :  { %668 = shalt.err (!%p665_p0)
}
  0x22   :  { %53 = dma.hbm_to_vmem [thread:$0]  %s837_s3, 1024, %s48_s14, [#allocation6], %s719_s29, %s719_s29, %s720_s30  }
  0x23   :  { %s677_s0 = scalar_lea.vmem %s62_s16, 1024  ;;  %p682_p2 = scmp.lt.s32.totalorder %s62_s16, %s62_s16 }
  0x24   :  { %p678_p1 = scmp.ne.s32.totalorder %s62_s16, %s677_s0  ;;  %p683_p3 = scmp.lt.s32.totalorder %s677_s0, %s677_s0 }
  0x26   :  { %p684_p4 = por %p683_p3, %p682_p2 }
  0x28   :  { %p685_p5 = pnand %p684_p4, %p678_p1 }
  0x2a   :  { %688 = shalt.err (!%p685_p5)
}
  0x2b   :  { %67 = dma.hbm_to_vmem [thread:$0]  %s839_s5, 1024, %s62_s16, [#allocation9], %s719_s29, %s719_s29, %s720_s30  }
  0x2c   :  { %709 = dma.done.wait [#allocation3], 128  }
  0x2d   :  { %710 = vsyncadd [#allocation3], 4294967168 }
  0x2e   :  { %711 = dma.done.wait [#allocation6], 2048  }
  0x2f   :  { %712 = vsyncadd [#allocation6], 4294965248 }
  0x30   :  { %713 = dma.done.wait [#allocation9], 1024  }
  0x31   :  { %714 = vsyncadd [#allocation9], 4294966272  ;;  %v723_v0 = vmov 0.0   ;;  %vm724_vm0 = vmmov 0   ;;  %v584_v1 = vld [vmem:[#allocation5 + $0x38] sm:$0xff]   ;;  %v585_v2 = vld [vmem:[#allocation5 + $0x30] sm:$0xff]  }
  0x32   :  { %513 = vmatprep.subr.bf16.mxu0 %v723_v0  ;;  %529 = vmatprep.mubr.msk.bf16.mxu0 %vm724_vm0, %v723_v0  ;;  %v586_v3 = vld [vmem:[#allocation5 + $0x28] sm:$0xff]   ;;  %v593_v4 = vld [vmem:[#allocation7 + $0x38] sm:$0xff]   ;;  %v587_v5 = vld [vmem:[#allocation5 + $0x20] sm:$0xff]   ;;  %s725_s24 = smov [#allocation10]  }
  0x33   :  { %533 = vmatprep.subr.bf16.mxu1 %v723_v0  ;;  %549 = vmatprep.mubr.msk.bf16.mxu1 %vm724_vm0, %v723_v0  ;;  %v594_v6 = vld [vmem:[#allocation7 + $0x30] sm:$0xff]   ;;  %v588_v7 = vld [vmem:[#allocation5 + $0x18] sm:$0xff]   ;;  %v595_v8 = vld [vmem:[#allocation7 + $0x28] sm:$0xff]   ;;  %s444_s25 = sshll.u32 %s725_s24, 4  ;;  %s445_s25 = int_to_ptr.vmem [resolvable:$true] %s444_s25 }
  0x34   :  { %514 = vmatpush3.bf16.msra.mxu0 %v584_v1  ;;  %534 = vmatpush3.bf16.msra.mxu1 %v593_v4  ;;  %v589_v9 = vld [vmem:[#allocation5 + $0x10] sm:$0xff]   ;;  %v596_v10 = vld [vmem:[#allocation7 + $0x20] sm:$0xff]   ;;  %v590_v11 = vld [vmem:[#allocation5 + $0x8] sm:$0xff]   ;;  %p694_p7 = scmp.lt.s32.totalorder %s445_s25, %s445_s25 }
  0x35   :  { %515 = vmatprep.subr.bf16.mxu0 %v723_v0  ;;  %535 = vmatprep.subr.bf16.mxu1 %v723_v0  ;;  %v597_v12 = vld [vmem:[#allocation7 + $0x18] sm:$0xff]   ;;  %v591_v13 = vld [vmem:[#allocation5] sm:$0xff]   ;;  %v598_v15 = vld [vmem:[#allocation7 + $0x10] sm:$0xff]  }
  0x36   :  { %v592_v14 = vld [vmem:[#allocation2] sm:$0xff]   ;;  %v599_v16 = vld [vmem:[#allocation7 + $0x8] sm:$0xff]   ;;  %v600_v17 = vld [vmem:[#allocation7] sm:$0xff]  }
  0x37   :  { %v601_v18 = vld [vmem:[#allocation8 + $0x38] sm:$0xff]   ;;  %v602_v19 = vld [vmem:[#allocation8 + $0x30] sm:$0xff]   ;;  %v603_v20 = vld [vmem:[#allocation8 + $0x28] sm:$0xff]  }
  0x38   :  { %516 = vmatpush3.bf16.msra.mxu0 %v585_v2  ;;  %536 = vmatpush3.bf16.msra.mxu1 %v594_v6  ;;  %v604_v21 = vld [vmem:[#allocation8 + $0x20] sm:$0xff]   ;;  %v605_v22 = vld [vmem:[#allocation8 + $0x18] sm:$0xff]   ;;  %v606_v35 = vld [vmem:[#allocation8 + $0x10] sm:$0xff]  }
  0x39   :  { %517 = vmatprep.subr.bf16.mxu0 %v723_v0  ;;  %537 = vmatprep.subr.bf16.mxu1 %v723_v0  ;;  %v458_v23 = vld [vmem:[%s836_s2] ss:$0 sm:$0xff]  ;;  %v607_v36 = vld [vmem:[#allocation8 + $0x8] sm:$0xff]   ;;  %v608_v37 = vld [vmem:[#allocation8] sm:$0xff]  }
  0x3a   :  { %v468_v38 = vld [vmem:[%s838_s4] ss:$0 sm:$0xff]  ;;  %s689_s4 = scalar_lea.vmem %s445_s25, 256 }
  0x3b   :  { %v477_v48 = vld [vmem:[%s840_s6] ss:$0 sm:$0xff]  ;;  %p690_p6 = scmp.ne.s32.totalorder %s445_s25, %s689_s4  ;;  %p695_p8 = scmp.lt.s32.totalorder %s689_s4, %s689_s4 }
  0x3c   :  { %518 = vmatpush3.bf16.msra.mxu0 %v586_v3  ;;  %538 = vmatpush3.bf16.msra.mxu1 %v595_v8 }
  0x3d   :  { %519 = vmatprep.subr.bf16.mxu0 %v723_v0  ;;  %539 = vmatprep.subr.bf16.mxu1 %v723_v0  ;;  %p696_p9 = por %p695_p8, %p694_p7 }
  0x3f   :  { %p697_p10 = pnand %p696_p9, %p690_p6 }
  0x40   :  { %520 = vmatpush3.bf16.msra.mxu0 %v587_v5  ;;  %540 = vmatpush3.bf16.msra.mxu1 %v596_v10 }
  0x41   :  { %521 = vmatprep.subr.bf16.mxu0 %v723_v0  ;;  %541 = vmatprep.subr.bf16.mxu1 %v723_v0 }
  0x44   :  { %522 = vmatpush3.bf16.msra.mxu0 %v588_v7  ;;  %542 = vmatpush3.bf16.msra.mxu1 %v597_v12 }
  0x45   :  { %523 = vmatprep.subr.bf16.mxu0 %v723_v0  ;;  %543 = vmatprep.subr.bf16.mxu1 %v723_v0 }
  0x48   :  { %524 = vmatpush3.bf16.msra.mxu0 %v589_v9  ;;  %544 = vmatpush3.bf16.msra.mxu1 %v598_v15 }
  0x49   :  { %525 = vmatprep.subr.bf16.mxu0 %v723_v0  ;;  %545 = vmatprep.subr.bf16.mxu1 %v723_v0 }
  0x4c   :  { %526 = vmatpush3.bf16.msra.mxu0 %v590_v11  ;;  %546 = vmatpush3.bf16.msra.mxu1 %v599_v16 }
  0x4d   :  { %527 = vmatprep.subr.bf16.mxu0 %v723_v0  ;;  %547 = vmatprep.subr.bf16.mxu1 %v723_v0 }
  0x50   :  { %528 = vmatpush3.bf16.msra.mxu0 %v591_v13  ;;  %548 = vmatpush3.bf16.msra.mxu1 %v600_v17 }
  0x51   :  { %553 = vmatprep.subr.bf16.mxu0 %v723_v0 }
  0x53   :  { %530 = vmatmul.mubr.bf16.vlgmr.msra.gmra.mxu0 %v592_v14 }
  0x54   :  { %569 = vmatprep.mubr.msk.bf16.mxu0 %vm724_vm0, %v723_v0  ;;  %554 = vmatpush3.bf16.msra.mxu0 %v601_v18 }
  0x55   :  { %555 = vmatprep.subr.bf16.mxu0 %v723_v0 }
  0x58   :  { %556 = vmatpush3.bf16.msra.mxu0 %v602_v19 }
  0x59   :  { %557 = vmatprep.subr.bf16.mxu0 %v723_v0 }
  0x5c   :  { %558 = vmatpush3.bf16.msra.mxu0 %v603_v20 }
  0x5d   :  { %559 = vmatprep.subr.bf16.mxu0 %v723_v0 }
  0x60   :  { %560 = vmatpush3.bf16.msra.mxu0 %v604_v21 }
  0x61   :  { %561 = vmatprep.subr.bf16.mxu0 %v723_v0 }
  0x64   :  { %562 = vmatpush3.bf16.msra.mxu0 %v605_v22 }
  0x65   :  { %563 = vmatprep.subr.bf16.mxu0 %v723_v0 }
  0x68   :  { %564 = vmatpush3.bf16.msra.mxu0 %v606_v35 }
  0x69   :  { %565 = vmatprep.subr.bf16.mxu0 %v723_v0 }
  0x6c   :  { %566 = vmatpush3.bf16.msra.mxu0 %v607_v36 }
  0x6d   :  { %567 = vmatprep.subr.bf16.mxu0 %v723_v0 }
  0x70   :  { %568 = vmatpush3.bf16.msra.mxu0 %v608_v37 }
 0x113   :  { %v196_v24 = vpop.f32.mrf.mxu0 }
 0x114   :  { %v197_v25 = vadd.f32 %v458_v23, %v196_v24 }
 0x115   :  { %v531_v26 = vpop.f32.mrf.mxu0 }
 0x116   :  { %v205_v28 = vmul.f32 0.001, %v197_v25  ;;  %vm203_vm1 = vcmp.gt.f32.partialorder %v197_v25, 0.0 }
 0x117   :  { %v199_v27 = vpop.f32.mrf.mxu0 }
 0x118   :  { %v200_v29 = vadd.f32 %v458_v23, %v199_v27  ;;  %v207_v32 = vsel %vm203_vm1, %v197_v25, %v205_v28 }
 0x119   :  { %v532_v30 = vpop.f32.mrf.mxu0 }
 0x11a   :  { %vm204_vm2 = vcmp.gt.f32.partialorder %v200_v29, 0.0  ;;  %v206_v31 = vmul.f32 0.001, %v200_v29 }
 0x11c   :  { %v208_v33 = vsel %vm204_vm2, %v200_v29, %v206_v31 }
 0x11d   :  { %v209_v34 = vpack.c.bf16 %v208_v33, %v207_v32 }
 0x11f   :  { %550 = vmatmul.mubr.bf16.vlgmr.msra.gmra.mxu1 %v209_v34 }
 0x1df   :  { %v315_v39 = vpop.f32.mrf.mxu1 }
 0x1e0   :  { %v316_v41 = vadd.f32 %v468_v38, %v315_v39 }
 0x1e1   :  { %v551_v40 = vpop.f32.mrf.mxu1 }
 0x1e2   :  { %v322_v45 = vmax.f32 %v316_v41, 0.0 }
 0x1e3   :  { %v318_v42 = vpop.f32.mrf.mxu1 }
 0x1e4   :  { %v319_v43 = vadd.f32 %v468_v38, %v318_v42 }
 0x1e5   :  { %v552_v44 = vpop.f32.mrf.mxu1 }
 0x1e6   :  { %v323_v46 = vmax.f32 %v319_v43, 0.0 }
 0x1e8   :  { %v324_v47 = vpack.c.bf16 %v323_v46, %v322_v45 }
 0x1ea   :  { %570 = vmatmul.mubr.bf16.vlgmr.msra.gmra.mxu0 %v324_v47 }
 0x2aa   :  { %v430_v49 = vpop.f32.mrf.mxu0 }
 0x2ab   :  { %v431_v50 = vadd.f32 %v477_v48, %v430_v49 }
 0x2ac   :  { %v571_v51 = vpop.f32.mrf.mxu0 }
 0x2ad   :  { %437 = vst [vmem:[#allocation10] sm:$0xff] %v431_v50 }
 0x2ae   :  { %v433_v52 = vpop.f32.mrf.mxu0 }
 0x2af   :  { %v434_v53 = vadd.f32 %v477_v48, %v433_v52 }
 0x2b0   :  { %v572_v54 = vpop.f32.mrf.mxu0 }
 0x2b1   :  { %438 = vst [vmem:[#allocation10 + $0x8] sm:$0xff] %v434_v53 }
 0x2b2   :  { %700 = shalt.err (!%p697_p10)
}
 0x2b3   :  { %s726_s26 = smov 128   ;;  %s727_s6 = smov 8  }
 0x2b4   :  { %450 = dma.vmem_to_hbm [thread:$0]  %s445_s25, 256, %s841_s7, [#allocation4], %s726_s26, %s726_s26, %s727_s6  }
 0x2b5   :  { %715 = dma.done.wait [#allocation4], 256  }
 0x2b6   :  { %716 = vsyncadd [#allocation4], 4294967040 }
 0x2b7   :  { %454 = vsyncpa [#allocation3], 1 }
 0x2b8   :  { %455 = vsyncpa [#allocation6], 1 }
 0x2b9   :  { %456 = vsyncpa [#allocation9], 1 }
 0x2ba   :  { %457 = vsyncpa [#allocation4], 1 }

</bundles_post_ra>
